<compile_context>
chip_gen: v6e
topology: v6e:2x2x1
jax: 0.10.0
libtpu: 0.0.40
codegen_flags: <defaults>
</compile_context>

<pallas_src>
import jax
import jax.numpy as jnp
from jax.experimental import pallas as pl
from jax.experimental.pallas import tpu as pltpu


def _clamp_kernel(val_ref, x_ref, o_ref):
    # val lives in SMEM as a single f32 scalar.
    v = val_ref[0]
    x = x_ref[...]
    hi = v.astype(x.dtype)
    lo = (-v).astype(x.dtype)
    o_ref[...] = jnp.clip(x, lo, hi)


def _round_up(a: int, b: int) -> int:
    return ((a + b - 1) // b) * b


def clamp(x, val, *, lane_width: int = 1024, target_block_bytes: int = 4 * 1024 * 1024):
    """Clamp all values of `x` into [-val, val].

    If `val` is None, returns `x` unchanged (matches the PyTorch module).
    `val` may be a Python scalar or a traced JAX scalar.
    """
    if val is None:
        return x

    orig_shape = x.shape
    dtype = x.dtype
    n = x.size
    if n == 0:
        return x

    # --- lane-dense 2-D layout -------------------------------------------
    # Last dim L is a (large) multiple of 128; for tiny inputs shrink L so we
    # never pad more than 127 elements.
    L = min(lane_width, _round_up(n, 128))
    rows = pl.cdiv(n, L)
    pad = rows * L - n

    x_flat = jnp.ravel(x)
    if pad:  # static Python int -> only pays the copy when padding is needed
        x_flat = jnp.pad(x_flat, (0, pad))
    x2d = x_flat.reshape(rows, L)

    # --- block sizing: ~target_block_bytes per block -----------------------
    itemsize = jnp.dtype(dtype).itemsize
    target_rows = max(8, target_block_bytes // (L * itemsize))
    if rows <= target_rows:
        tile_rows = rows                      # single block along rows (full dim ok)
    else:
        tile_rows = (target_rows // 8) * 8    # multiple of 8 sublanes

    grid = (pl.cdiv(rows, tile_rows),)

    # Scalar clamp bound in SMEM (f32; cast to x.dtype inside the kernel).
    val_arr = jnp.asarray(val, dtype=jnp.float32).reshape(1)

    grid_spec = pl.GridSpec(
        grid=grid,
        in_specs=[
            pl.BlockSpec(memory_space=pltpu.MemorySpace.SMEM),      # val scalar
            pl.BlockSpec((tile_rows, L), lambda i: (i, 0)),         # x tile
        ],
        out_specs=pl.BlockSpec((tile_rows, L), lambda i: (i, 0)),
    )

    out2d = pl.pallas_call(
        _clamp_kernel,
        out_shape=jax.ShapeDtypeStruct((rows, L), dtype),
        grid_spec=grid_spec,
        compiler_params=pltpu.CompilerParams(
            dimension_semantics=("parallel",),
            vmem_limit_bytes=48 * 1024 * 1024,
        ),
    )(val_arr, x2d)

    out_flat = out2d.reshape(-1)
    if pad:
        out_flat = out_flat[:n]
    return out_flat.reshape(orig_shape)


if __name__ == "__main__":
    key = jax.random.PRNGKey(0)
    # NCHW input, same conventions as the PyTorch module's expected usage.
    x = jax.random.normal(key, (2, 4, 16, 16), dtype=jnp.float32) * 3.0

    val = 1.0
    out = clamp(x, val)
    out = jax.block_until_ready(out)

    # Reference check in plain JAX.
    ref = jnp.clip(x, -val, val)
    assert out.shape == x.shape and out.dtype == x.dtype
    assert jnp.allclose(out, ref), "mismatch vs reference clamp"

    # Non-divisible size (exercises the minimal-pad path).
    x_odd = jax.random.normal(jax.random.PRNGKey(1), (3, 5, 7), dtype=jnp.float32) * 2.0
    out_odd = jax.block_until_ready(clamp(x_odd, 0.5))
    assert jnp.allclose(out_odd, jnp.clip(x_odd, -0.5, 0.5))

    # val=None path: identity.
    out_none = clamp(x, None)
    assert jnp.array_equal(out_none, x)

    print("KERNEL_OK")
</pallas_src>

<mosaic_0001>
module attributes {stable_mosaic.version = 11 : i64} {
  func.func @_clamp_kernel(%arg0: i32, %arg1: memref<1xf32, #tpu.memory_space<smem>>, %arg2: memref<2x1024xf32, #tpu.memory_space<vmem>>, %arg3: memref<2x1024xf32, #tpu.memory_space<vmem>>) attributes {dimension_semantics = [#tpu.dimension_semantics<parallel>], iteration_bounds = array<i64: 1>, scalar_prefetch = 0 : i64, scratch_operands = 0 : i64, tpu.core_type = #tpu.core_type<tc>, window_params = [{transform_indices = @transform_0, window_bounds = array<i64: 1>}, {transform_indices = @transform_1, window_bounds = array<i64: 2, 1024>}, {transform_indices = @transform_2, window_bounds = array<i64: 2, 1024>}]} {
    %c0 = arith.constant 0 : index
    %0 = memref.load %arg1[%c0] : memref<1xf32, #tpu.memory_space<smem>>
    %c0_0 = arith.constant 0 : index
    %c0_1 = arith.constant 0 : index
    %1 = vector.load %arg2[%c0_0, %c0_1] : memref<2x1024xf32, #tpu.memory_space<vmem>>, vector<2x1024xf32>
    %cst = arith.constant 0.000000e+00 : f32
    %2 = arith.subf %cst, %0 : f32
    %3 = vector.broadcast %2 : f32 to vector<2x1024xf32>
    %4 = arith.maximumf %3, %1 : vector<2x1024xf32>
    %5 = vector.broadcast %0 : f32 to vector<2x1024xf32>
    %6 = arith.minimumf %5, %4 : vector<2x1024xf32>
    %c0_2 = arith.constant 0 : index
    %c0_3 = arith.constant 0 : index
    %7 = vector.load %arg3[%c0_2, %c0_3] : memref<2x1024xf32, #tpu.memory_space<vmem>>, vector<2x1024xf32>
    tpu.vector_store %arg3[%c0_2, %c0_3], %6 {strides = array<i32>} : memref<2x1024xf32, #tpu.memory_space<vmem>>, vector<2x1024xf32>,
    return
  }
  func.func @transform_0(%arg0: i32) -> i32 {
    %c0_i32 = arith.constant 0 : i32
    %c0_i32_0 = arith.constant 0 : i32
    return %c0_i32 : i32
  }
  func.func @transform_1(%arg0: i32) -> (i32, i32) {
    %c0_i32 = arith.constant 0 : i32
    %c0_i32_0 = arith.constant 0 : i32
    return %arg0, %c0_i32 : i32, i32
  }
  func.func @transform_2(%arg0: i32) -> (i32, i32) {
    %c0_i32 = arith.constant 0 : i32
    %c0_i32_0 = arith.constant 0 : i32
    return %arg0, %c0_i32 : i32, i32
  }
}

</mosaic_0001>

<bundles_post_ra>
// kernel: tpu_custom_call.1
= control target key start
LH: loop header
LB: loop body
LE: loop exit
PB: predicated region body
PF: predicated region fallthrough
CT: control target
= control target key end

     0   :  { %8 = vsyncpa [#allocation4], 0  ;;  %s127_s0 = inlined_call_operand.<no memory space> [shape: f32[1], index: 0, kind: input, shape index: {}]   ;;  %s128_s1 = inlined_call_operand.hbm [shape: f32[2,1024], index: 1, kind: input, shape index: {}]   ;;  %s129_s2 = inlined_call_operand.hbm [shape: f32[2,1024], index: 2, kind: output, shape index: {}]  }
   0x1   :  { %9 = vsyncpa [#allocation5], 0  ;;  %s98_s9 = smov [#allocation3]  }
   0x2   :  { %s18_s10 = sshll.u32 %s98_s9, 4  ;;  %s19_s10 = int_to_ptr.vmem [resolvable:$true] %s18_s10 }
   0x3   :  { %s62_s11 = scalar_lea.vmem %s19_s10, 256  ;;  %p67_p1 = scmp.lt.s32.totalorder %s19_s10, %s19_s10 }
   0x4   :  { %p63_p0 = scmp.ne.s32.totalorder %s19_s10, %s62_s11  ;;  %p68_p2 = scmp.lt.s32.totalorder %s62_s11, %s62_s11 }
   0x6   :  { %p69_p3 = por %p68_p2, %p67_p1 }
   0x8   :  { %p70_p4 = pnand %p69_p3, %p63_p0 }
   0xa   :  { %73 = shalt.err (!%p70_p4)
}
   0xb   :  { %21 = dma.hbm_to_vmem [thread:$0]  %s128_s1, 256, %s19_s10, [#allocation4]  }
   0xc   :  { %94 = dma.done.wait [#allocation4], 256  }
   0xd   :  { %95 = vsyncadd [#allocation4], 4294967040  ;;  %s28_s16 = ssub.f32 0.0, %s127_s0  ;;  %v26_v1 = vld [vmem:[#allocation3] sm:$0xff]  ;;  %v32_v2 = vstv %s127_s0  ;;  %v27_v3 = vld [vmem:[#allocation3 + $0x8] sm:$0xff]  ;;  %s99_s19 = smov [#allocation6]  }
   0xe   :  { %s43_s20 = sshll.u32 %s99_s19, 4  ;;  %s44_s20 = int_to_ptr.vmem [resolvable:$true] %s43_s20 }
   0xf   :  { %v29_v0 = vstv %s28_s16  ;;  %s74_s1 = scalar_lea.vmem %s44_s20, 256  ;;  %p79_p6 = scmp.lt.s32.totalorder %s44_s20, %s44_s20 }
  0x10   :  { %v30_v4 = vmax.f32 %v29_v0, %v26_v1  ;;  %v31_v5 = vmax.f32 %v29_v0, %v27_v3  ;;  %p75_p5 = scmp.ne.s32.totalorder %s44_s20, %s74_s1  ;;  %p80_p7 = scmp.lt.s32.totalorder %s74_s1, %s74_s1 }
  0x12   :  { %v33_v6 = vmin.f32 %v32_v2, %v30_v4  ;;  %v34_v7 = vmin.f32 %v32_v2, %v31_v5  ;;  %p81_p8 = por %p80_p7, %p79_p6 }
  0x14   :  { %35 = vst [vmem:[#allocation6] sm:$0xff] %v33_v6  ;;  %36 = vst [vmem:[#allocation6 + $0x8] sm:$0xff] %v34_v7  ;;  %p82_p9 = pnand %p81_p8, %p75_p5 }
  0x16   :  { %85 = shalt.err (!%p82_p9)
}
  0x17   :  { %46 = dma.vmem_to_hbm [thread:$0]  %s44_s20, 256, %s129_s2, [#allocation5]  }
  0x18   :  { %96 = dma.done.wait [#allocation5], 256  }
  0x19   :  { %97 = vsyncadd [#allocation5], 4294967040 }
  0x1a   :  { %50 = vsyncpa [#allocation4], 1 }
  0x1b   :  { %51 = vsyncpa [#allocation5], 1 }

</bundles_post_ra>
